<compile_context>
chip_gen: v7x
topology: tpu7x:2x2x1
jax: 0.10.0
libtpu: 0.0.40
codegen_flags: <defaults>
</compile_context>

<pallas_src>
import functools

import jax
import jax.numpy as jnp
from jax import lax
from jax.experimental import pallas as pl
from jax.experimental.pallas import tpu as pltpu

NUM_CLASSES = 4  # stands in for args.num_classes in the reference code
_MIB = 1024 * 1024


def _jaccard_kernel(x_ref, y_ref, out_ref, inter_acc, psum_acc, *, ch, sub):
    """One (W-tile, N, H-tile) grid step.

    x_ref:   (C, th, tw) logits (f32 or bf16)        -- batch dim squeezed
    y_ref:   (th, tw)    integer labels (int8/int32) -- batch dim squeezed
    out_ref: (C, tw)     f32 loss tile (written only on the last step)
    inter_acc / psum_acc: (C, sub, tw) f32 running partial sums.
    """
    n = pl.program_id(1)          # batch step   (reduction axis)
    h = pl.program_id(2)          # H-tile step  (reduction axis)
    is_first = jnp.logical_and(n == 0, h == 0)
    is_last = jnp.logical_and(n == pl.num_programs(1) - 1,
                              h == pl.num_programs(2) - 1)

    @pl.when(is_first)
    def _():
        inter_acc[...] = jnp.zeros_like(inter_acc)
        psum_acc[...] = jnp.zeros_like(psum_acc)

    num_cls = x_ref.shape[0]
    th = x_ref.shape[1]
    tw = x_ref.shape[2]
    n_chunks = th // ch

    def process(row0):
        # Load one sublane chunk; bf16 logits are cast to f32 in-VMEM (cheap
        # VPU cast; exp / accumulation stay in f32 on the EUP/VALU).
        x = x_ref[:, pl.ds(row0, ch), :].astype(jnp.float32)     # (C, ch, tw)
        y = y_ref[pl.ds(row0, ch), :].astype(jnp.int32)          # (ch, tw)

        # Softmax over the channel axis (axis 0 here): channels live in
        # separate vregs, so these max/sum reductions are plain VALU ops.
        m = jnp.max(x, axis=0, keepdims=True)
        e = jnp.exp(x - m)                                       # EUP
        denom = jnp.sum(e, axis=0, keepdims=True)
        # EUP approx reciprocal + one Newton step (~f32 accurate) keeps the
        # divide off the VALU.  TODO(synk): on v7x (VALU-bound) drop the NR
        # step per the perf review and re-validate the tolerance.
        r = pl.reciprocal(denom, approx=True)
        r = r * (2.0 - denom * r)
        p = e * r                                                # (C, ch, tw)

        # Per-channel scalar-splat compares (no materialized iota / one-hot),
        # keeping `sub` sublanes of partial sums so this loop is pure vreg
        # adds; the cross-sublane reduce is deferred to the finalize.
        for c in range(num_cls):
            p_c = p[c]                                           # (ch, tw)
            psum_acc[c] += jnp.sum(p_c.reshape(ch // sub, sub, tw), axis=0)
            masked = jnp.where(y == c, p_c, 0.0)
            inter_acc[c] += jnp.sum(masked.reshape(ch // sub, sub, tw), axis=0)

    if n_chunks == 1:
        process(0)
    else:
        def body(i, carry):
            process(pl.multiple_of(i * ch, ch))
            return carry
        lax.fori_loop(0, n_chunks, body, 0, unroll=(n_chunks <= 8))

    @pl.when(is_last)
    def _():
        # One cross-sublane (XLU) reduce per W tile, then an exact finalize.
        intersection = jnp.sum(inter_acc[...], axis=1)           # (C, tw)
        psum = jnp.sum(psum_acc[...], axis=1)                    # (C, tw)
        cardinality = 2.0 * psum          # faithful quirk: sum(x) + sum(x)
        union = cardinality - intersection
        out_ref[...] = 1.0 - intersection / (union + 1.0)        # eps = 1


def _vmem_limit_bytes():
    """Generation-aware scoped-VMEM limit: half of physical, clamped 32-64 MiB
    (64 MiB on v5e/v6e's 128 MiB VMEM, 32 MiB on v7x's 64 MiB VMEM)."""
    cap = 128 * _MIB
    try:
        cap = int(getattr(pltpu.get_tpu_info(), "vmem_capacity_bytes", cap))
    except Exception:  # interpret mode / query not available
        pass
    return int(max(32 * _MIB, min(cap // 2, 64 * _MIB)))


def _choose_h_tile(C, H, W, itemsize, target_bytes):
    """Sublane tile for the x DMA block: full H when it fits the budget, else
    the largest divisor of H (preferring multiples of 32 so labels can stay
    int8) whose (C, th, W) block stays under `target_bytes`."""
    def fits(t):
        return C * t * W * itemsize <= target_bytes

    if fits(H):
        return H
    min_step = 16 if itemsize == 2 else 8          # bf16 packs 16 sublanes
    steps = [s for s in (32, 16, 8) if s >= min_step]
    for step in steps:
        cands = [t for t in range(step, H, step) if H % t == 0 and fits(t)]
        if cands:
            return max(cands)
    # Nothing under budget: take the smallest legal divisor tile so the block
    # stays bounded (never fall back to an unbounded full-H block).
    for step in reversed(steps):
        cands = [t for t in range(step, H, step) if H % t == 0]
        if cands:
            return min(cands)
    return H  # H has no multiple-of-8 divisor: full-extent block is the only legal choice


def _choose_chunk(C, th, W, budget_bytes=2 * _MIB):
    """In-kernel compute chunk (rows).  Bounds the per-chunk f32 intermediates
    so large DMA blocks still fit v7x's 64 MiB VMEM.  Multiple of 8 dividing
    th when possible (enables the deferred-sublane-reduce path)."""
    if th % 8 != 0:
        return th
    cands = [t for t in range(8, th + 1, 8)
             if th % t == 0 and C * t * W * 4 <= budget_bytes]
    return max(cands) if cands else 8


def jaccard_loss(x, y, *, target_block_bytes=6 * _MIB):
    """JaccardLoss forward.

    x: (N, C, H, W) logits.  float32 or bfloat16 -- bf16 is the fast path
       (halves the dominant HBM stream; the kernel still computes in f32).
    y: (N, H, W) integer labels in [0, C).

    Returns (C, W) float32, matching the PyTorch reduction over dims (0, 2).
    """
    N, C, H, W = x.shape
    itemsize = jnp.dtype(x.dtype).itemsize

    vmem_limit = _vmem_limit_bytes()
    # Leave headroom for the double-buffered x blocks (2x), y blocks, the
    # accumulators and the in-kernel f32 chunk intermediates.
    target = min(target_block_bytes, vmem_limit // 5)

    tw = W                       # full width: contiguous per-channel DMA runs
    th = _choose_h_tile(C, H, tw, itemsize, target)
    ch = _choose_chunk(C, th, tw)
    sub = 8 if ch % 8 == 0 else 1

    # Labels: int8 in HBM (4x less label traffic vs int32) whenever the y
    # block tiling is int8-legal (full-H block or th % 32 == 0).
    if C <= 127 and (th == H or th % 32 == 0):
        y = y.astype(jnp.int8)
    else:
        y = y.astype(jnp.int32)

    grid = (W // tw, N, H // th)     # reduction axes (N, H) last

    kernel = functools.partial(_jaccard_kernel, ch=ch, sub=sub)

    # TODO(synk): on v7x, split W across the two TensorCores (CORE_PARALLEL /
    # pl.core_map) with per-core accumulators; single-TC-friendly config kept.
    # TODO(synk): if DMA is still exposed on v6e, sweep pl.Buffered(3) on x.
    return pl.pallas_call(
        kernel,
        out_shape=jax.ShapeDtypeStruct((C, W), jnp.float32),
        grid=grid,
        in_specs=[
            pl.BlockSpec((None, C, th, tw), lambda w, n, h: (n, 0, h, w)),
            pl.BlockSpec((None, th, tw), lambda w, n, h: (n, h, w)),
        ],
        out_specs=pl.BlockSpec((C, tw), lambda w, n, h: (0, w)),
        scratch_shapes=[
            pltpu.VMEM((C, sub, tw), jnp.float32),   # running intersection
            pltpu.VMEM((C, sub, tw), jnp.float32),   # running sum(softmax(x))
        ],
        compiler_params=pltpu.CompilerParams(
            dimension_semantics=("parallel", "arbitrary", "arbitrary"),
            vmem_limit_bytes=vmem_limit,
        ),
    )(x, y)


def _jaccard_loss_ref(x, y, num_classes=NUM_CLASSES):
    """Pure-JAX reference mirroring the PyTorch forward exactly."""
    p = jax.nn.softmax(x.astype(jnp.float32), axis=1)
    y_1h = jnp.transpose(jax.nn.one_hot(y, num_classes, dtype=jnp.float32),
                         (0, 3, 1, 2))
    dims = (0, 2)  # (0,) + tuple(range(2, y.ndim)) with y.ndim == 3
    intersection = jnp.sum(p * y_1h, axis=dims)
    cardinality = jnp.sum(p, axis=dims) + jnp.sum(p, axis=dims)
    union = cardinality - intersection
    return 1.0 - intersection / (union + 1.0)


if __name__ == "__main__":
    key = jax.random.PRNGKey(0)
    kx, ky = jax.random.split(key)

    N, C, H, W = 2, NUM_CLASSES, 16, 16
    x = jax.random.normal(kx, (N, C, H, W), dtype=jnp.float32)
    y = jax.random.randint(ky, (N, H, W), minval=0, maxval=NUM_CLASSES,
                           dtype=jnp.int32)

    out = jax.block_until_ready(jaccard_loss(x, y))
    ref = _jaccard_loss_ref(x, y)
    assert out.shape == (C, W), out.shape
    assert jnp.allclose(out, ref, atol=1e-4, rtol=1e-4), "mismatch vs reference"

    # bf16-in-HBM fast path (kernel casts to f32 internally); looser tolerance.
    out_bf16 = jax.block_until_ready(jaccard_loss(x.astype(jnp.bfloat16), y))
    ref_bf16 = _jaccard_loss_ref(x.astype(jnp.bfloat16), y)
    assert jnp.allclose(out_bf16, ref_bf16, atol=2e-2, rtol=2e-2), \
        "bf16 mismatch vs reference"

    print("KERNEL_OK")
</pallas_src>

<mosaic_0001>
module attributes {stable_mosaic.version = 11 : i64} {
  func.func @_jaccard_kernel(%arg0: i32, %arg1: i32, %arg2: i32, %arg3: memref<1x4x16x16xf32, #tpu.memory_space<vmem>>, %arg4: memref<1x16x16xi8, #tpu.memory_space<vmem>>, %arg5: memref<4x16xf32, #tpu.memory_space<vmem>>, %arg6: memref<4x8x16xf32, #tpu.memory_space<vmem>>, %arg7: memref<4x8x16xf32, #tpu.memory_space<vmem>>) attributes {dimension_semantics = [#tpu.dimension_semantics<parallel>, #tpu.dimension_semantics<arbitrary>, #tpu.dimension_semantics<arbitrary>], iteration_bounds = array<i64: 1, 2, 1>, scalar_prefetch = 0 : i64, scratch_operands = 2 : i64, tpu.core_type = #tpu.core_type<tc>, window_params = [{transform_indices = @transform_0, window_bounds = array<i64: 1, 4, 16, 16>}, {transform_indices = @transform_1, window_bounds = array<i64: 1, 16, 16>}, {transform_indices = @transform_2, window_bounds = array<i64: 4, 16>}]} {
    %c0_i32 = arith.constant 0 : i32
    %0 = arith.cmpi eq, %arg1, %c0_i32 : i32
    %c0_i32_0 = arith.constant 0 : i32
    %1 = arith.cmpi eq, %arg2, %c0_i32_0 : i32
    %2 = arith.andi %0, %1 : i1
    %c1_i32 = arith.constant 1 : i32
    %3 = arith.cmpi eq, %arg1, %c1_i32 : i32
    %c0_i32_1 = arith.constant 0 : i32
    %4 = arith.cmpi eq, %arg2, %c0_i32_1 : i32
    %5 = arith.andi %3, %4 : i1
    %6 = arith.extui %2 : i1 to i32
    %c0_i32_2 = arith.constant 0 : i32
    %7 = arith.cmpi ne, %6, %c0_i32_2 : i32
    scf.if %7 {
      %cst_71 = arith.constant 0.000000e+00 : f32
      %117 = vector.broadcast %cst_71 : f32 to vector<4x8x16xf32>
      %c0_72 = arith.constant 0 : index
      %c0_73 = arith.constant 0 : index
      %c0_74 = arith.constant 0 : index
      %118 = vector.load %arg6[%c0_72, %c0_73, %c0_74] : memref<4x8x16xf32, #tpu.memory_space<vmem>>, vector<4x8x16xf32>
      tpu.vector_store %arg6[%c0_72, %c0_73, %c0_74], %117 {strides = array<i32>} : memref<4x8x16xf32, #tpu.memory_space<vmem>>, vector<4x8x16xf32>,
      %cst_75 = arith.constant 0.000000e+00 : f32
      %119 = vector.broadcast %cst_75 : f32 to vector<4x8x16xf32>
      %c0_76 = arith.constant 0 : index
      %c0_77 = arith.constant 0 : index
      %c0_78 = arith.constant 0 : index
      %120 = vector.load %arg7[%c0_76, %c0_77, %c0_78] : memref<4x8x16xf32, #tpu.memory_space<vmem>>, vector<4x8x16xf32>
      tpu.vector_store %arg7[%c0_76, %c0_77, %c0_78], %119 {strides = array<i32>} : memref<4x8x16xf32, #tpu.memory_space<vmem>>, vector<4x8x16xf32>,
    } else {
    }
    %c0 = arith.constant 0 : index
    %c0_3 = arith.constant 0 : index
    %c0_4 = arith.constant 0 : index
    %c0_5 = arith.constant 0 : index
    %8 = vector.load %arg3[%c0, %c0_3, %c0_4, %c0_5] : memref<1x4x16x16xf32, #tpu.memory_space<vmem>>, vector<1x4x16x16xf32>
    %9 = vector.shape_cast %8 : vector<1x4x16x16xf32> to vector<4x16x16xf32>
    %c0_6 = arith.constant 0 : index
    %c0_7 = arith.constant 0 : index
    %c0_8 = arith.constant 0 : index
    %10 = vector.load %arg4[%c0_6, %c0_7, %c0_8] : memref<1x16x16xi8, #tpu.memory_space<vmem>>, vector<1x16x16xi8>
    %11 = vector.shape_cast %10 : vector<1x16x16xi8> to vector<16x16xi8>
    %12 = arith.extsi %11 : vector<16x16xi8> to vector<16x16xi32>
    %cst = arith.constant dense<0xFF800000> : vector<16x16xf32>
    %13 = vector.multi_reduction <maximumf>, %9, %cst [0] : vector<4x16x16xf32> to vector<16x16xf32>
    %14 = vector.shape_cast %13 : vector<16x16xf32> to vector<1x16x16xf32>
    %15 = vector.broadcast %14 : vector<1x16x16xf32> to vector<4x16x16xf32>
    %16 = arith.subf %9, %15 : vector<4x16x16xf32>
    %17 = math.exp %16 : vector<4x16x16xf32>
    %cst_9 = arith.constant dense<0.000000e+00> : vector<16x16xf32>
    %18 = vector.multi_reduction <add>, %17, %cst_9 [0] : vector<4x16x16xf32> to vector<16x16xf32>
    %19 = vector.shape_cast %18 : vector<16x16xf32> to vector<1x16x16xf32>
    %20 = tpu.reciprocal %19 {approx = true} : vector<1x16x16xf32> -> vector<1x16x16xf32>
    %21 = arith.mulf %19, %20 : vector<1x16x16xf32>
    %cst_10 = arith.constant 2.000000e+00 : f32
    %22 = vector.broadcast %cst_10 : f32 to vector<1x16x16xf32>
    %23 = arith.subf %22, %21 : vector<1x16x16xf32>
    %24 = arith.mulf %20, %23 : vector<1x16x16xf32>
    %25 = vector.broadcast %24 : vector<1x16x16xf32> to vector<4x16x16xf32>
    %26 = arith.mulf %17, %25 : vector<4x16x16xf32>
    %27 = vector.extract_strided_slice %26 {offsets = [0, 0, 0], sizes = [1, 16, 16], strides = [1, 1, 1]} : vector<4x16x16xf32> to vector<1x16x16xf32>
    %28 = vector.shape_cast %27 : vector<1x16x16xf32> to vector<16x16xf32>
    %c0_11 = arith.constant 0 : index
    %c0_12 = arith.constant 0 : index
    %c0_13 = arith.constant 0 : index
    %29 = vector.load %arg7[%c0_11, %c0_12, %c0_13] : memref<4x8x16xf32, #tpu.memory_space<vmem>>, vector<1x8x16xf32>
    %30 = vector.shape_cast %29 : vector<1x8x16xf32> to vector<8x16xf32>
    %31 = vector.shape_cast %28 : vector<16x16xf32> to vector<2x8x16xf32>
    %cst_14 = arith.constant dense<0.000000e+00> : vector<8x16xf32>
    %32 = vector.multi_reduction <add>, %31, %cst_14 [0] : vector<2x8x16xf32> to vector<8x16xf32>
    %33 = arith.addf %30, %32 : vector<8x16xf32>
    %c0_15 = arith.constant 0 : index
    %c0_16 = arith.constant 0 : index
    %c0_17 = arith.constant 0 : index
    %34 = vector.load %arg7[%c0_15, %c0_16, %c0_17] : memref<4x8x16xf32, #tpu.memory_space<vmem>>, vector<1x8x16xf32>
    %35 = vector.shape_cast %34 : vector<1x8x16xf32> to vector<8x16xf32>
    %36 = vector.shape_cast %33 : vector<8x16xf32> to vector<1x8x16xf32>
    tpu.vector_store %arg7[%c0_15, %c0_16, %c0_17], %36 {strides = array<i32>} : memref<4x8x16xf32, #tpu.memory_space<vmem>>, vector<1x8x16xf32>,
    %c0_i32_18 = arith.constant 0 : i32
    %37 = vector.broadcast %c0_i32_18 : i32 to vector<16x16xi32>
    %38 = arith.cmpi eq, %12, %37 : vector<16x16xi32>
    %cst_19 = arith.constant 0.000000e+00 : f32
    %39 = vector.broadcast %cst_19 : f32 to vector<16x16xf32>
    %40 = arith.select %38, %28, %39 : vector<16x16xi1>, vector<16x16xf32>
    %c0_20 = arith.constant 0 : index
    %c0_21 = arith.constant 0 : index
    %c0_22 = arith.constant 0 : index
    %41 = vector.load %arg6[%c0_20, %c0_21, %c0_22] : memref<4x8x16xf32, #tpu.memory_space<vmem>>, vector<1x8x16xf32>
    %42 = vector.shape_cast %41 : vector<1x8x16xf32> to vector<8x16xf32>
    %43 = vector.shape_cast %40 : vector<16x16xf32> to vector<2x8x16xf32>
    %cst_23 = arith.constant dense<0.000000e+00> : vector<8x16xf32>
    %44 = vector.multi_reduction <add>, %43, %cst_23 [0] : vector<2x8x16xf32> to vector<8x16xf32>
    %45 = arith.addf %42, %44 : vector<8x16xf32>
    %c0_24 = arith.constant 0 : index
    %c0_25 = arith.constant 0 : index
    %c0_26 = arith.constant 0 : index
    %46 = vector.load %arg6[%c0_24, %c0_25, %c0_26] : memref<4x8x16xf32, #tpu.memory_space<vmem>>, vector<1x8x16xf32>
    %47 = vector.shape_cast %46 : vector<1x8x16xf32> to vector<8x16xf32>
    %48 = vector.shape_cast %45 : vector<8x16xf32> to vector<1x8x16xf32>
    tpu.vector_store %arg6[%c0_24, %c0_25, %c0_26], %48 {strides = array<i32>} : memref<4x8x16xf32, #tpu.memory_space<vmem>>, vector<1x8x16xf32>,
    %49 = vector.extract_strided_slice %26 {offsets = [1, 0, 0], sizes = [1, 16, 16], strides = [1, 1, 1]} : vector<4x16x16xf32> to vector<1x16x16xf32>
    %50 = vector.shape_cast %49 : vector<1x16x16xf32> to vector<16x16xf32>
    %c1 = arith.constant 1 : index
    %c0_27 = arith.constant 0 : index
    %c0_28 = arith.constant 0 : index
    %51 = vector.load %arg7[%c1, %c0_27, %c0_28] : memref<4x8x16xf32, #tpu.memory_space<vmem>>, vector<1x8x16xf32>
    %52 = vector.shape_cast %51 : vector<1x8x16xf32> to vector<8x16xf32>
    %53 = vector.shape_cast %50 : vector<16x16xf32> to vector<2x8x16xf32>
    %cst_29 = arith.constant dense<0.000000e+00> : vector<8x16xf32>
    %54 = vector.multi_reduction <add>, %53, %cst_29 [0] : vector<2x8x16xf32> to vector<8x16xf32>
    %55 = arith.addf %52, %54 : vector<8x16xf32>
    %c1_30 = arith.constant 1 : index
    %c0_31 = arith.constant 0 : index
    %c0_32 = arith.constant 0 : index
    %56 = vector.load %arg7[%c1_30, %c0_31, %c0_32] : memref<4x8x16xf32, #tpu.memory_space<vmem>>, vector<1x8x16xf32>
    %57 = vector.shape_cast %56 : vector<1x8x16xf32> to vector<8x16xf32>
    %58 = vector.shape_cast %55 : vector<8x16xf32> to vector<1x8x16xf32>
    tpu.vector_store %arg7[%c1_30, %c0_31, %c0_32], %58 {strides = array<i32>} : memref<4x8x16xf32, #tpu.memory_space<vmem>>, vector<1x8x16xf32>,
    %c1_i32_33 = arith.constant 1 : i32
    %59 = vector.broadcast %c1_i32_33 : i32 to vector<16x16xi32>
    %60 = arith.cmpi eq, %12, %59 : vector<16x16xi32>
    %cst_34 = arith.constant 0.000000e+00 : f32
    %61 = vector.broadcast %cst_34 : f32 to vector<16x16xf32>
    %62 = arith.select %60, %50, %61 : vector<16x16xi1>, vector<16x16xf32>
    %c1_35 = arith.constant 1 : index
    %c0_36 = arith.constant 0 : index
    %c0_37 = arith.constant 0 : index
    %63 = vector.load %arg6[%c1_35, %c0_36, %c0_37] : memref<4x8x16xf32, #tpu.memory_space<vmem>>, vector<1x8x16xf32>
    %64 = vector.shape_cast %63 : vector<1x8x16xf32> to vector<8x16xf32>
    %65 = vector.shape_cast %62 : vector<16x16xf32> to vector<2x8x16xf32>
    %cst_38 = arith.constant dense<0.000000e+00> : vector<8x16xf32>
    %66 = vector.multi_reduction <add>, %65, %cst_38 [0] : vector<2x8x16xf32> to vector<8x16xf32>
    %67 = arith.addf %64, %66 : vector<8x16xf32>
    %c1_39 = arith.constant 1 : index
    %c0_40 = arith.constant 0 : index
    %c0_41 = arith.constant 0 : index
    %68 = vector.load %arg6[%c1_39, %c0_40, %c0_41] : memref<4x8x16xf32, #tpu.memory_space<vmem>>, vector<1x8x16xf32>
    %69 = vector.shape_cast %68 : vector<1x8x16xf32> to vector<8x16xf32>
    %70 = vector.shape_cast %67 : vector<8x16xf32> to vector<1x8x16xf32>
    tpu.vector_store %arg6[%c1_39, %c0_40, %c0_41], %70 {strides = array<i32>} : memref<4x8x16xf32, #tpu.memory_space<vmem>>, vector<1x8x16xf32>,
    %71 = vector.extract_strided_slice %26 {offsets = [2, 0, 0], sizes = [1, 16, 16], strides = [1, 1, 1]} : vector<4x16x16xf32> to vector<1x16x16xf32>
    %72 = vector.shape_cast %71 : vector<1x16x16xf32> to vector<16x16xf32>
    %c2 = arith.constant 2 : index
    %c0_42 = arith.constant 0 : index
    %c0_43 = arith.constant 0 : index
    %73 = vector.load %arg7[%c2, %c0_42, %c0_43] : memref<4x8x16xf32, #tpu.memory_space<vmem>>, vector<1x8x16xf32>
    %74 = vector.shape_cast %73 : vector<1x8x16xf32> to vector<8x16xf32>
    %75 = vector.shape_cast %72 : vector<16x16xf32> to vector<2x8x16xf32>
    %cst_44 = arith.constant dense<0.000000e+00> : vector<8x16xf32>
    %76 = vector.multi_reduction <add>, %75, %cst_44 [0] : vector<2x8x16xf32> to vector<8x16xf32>
    %77 = arith.addf %74, %76 : vector<8x16xf32>
    %c2_45 = arith.constant 2 : index
    %c0_46 = arith.constant 0 : index
    %c0_47 = arith.constant 0 : index
    %78 = vector.load %arg7[%c2_45, %c0_46, %c0_47] : memref<4x8x16xf32, #tpu.memory_space<vmem>>, vector<1x8x16xf32>
    %79 = vector.shape_cast %78 : vector<1x8x16xf32> to vector<8x16xf32>
    %80 = vector.shape_cast %77 : vector<8x16xf32> to vector<1x8x16xf32>
    tpu.vector_store %arg7[%c2_45, %c0_46, %c0_47], %80 {strides = array<i32>} : memref<4x8x16xf32, #tpu.memory_space<vmem>>, vector<1x8x16xf32>,
    %c2_i32 = arith.constant 2 : i32
    %81 = vector.broadcast %c2_i32 : i32 to vector<16x16xi32>
    %82 = arith.cmpi eq, %12, %81 : vector<16x16xi32>
    %cst_48 = arith.constant 0.000000e+00 : f32
    %83 = vector.broadcast %cst_48 : f32 to vector<16x16xf32>
    %84 = arith.select %82, %72, %83 : vector<16x16xi1>, vector<16x16xf32>
    %c2_49 = arith.constant 2 : index
    %c0_50 = arith.constant 0 : index
    %c0_51 = arith.constant 0 : index
    %85 = vector.load %arg6[%c2_49, %c0_50, %c0_51] : memref<4x8x16xf32, #tpu.memory_space<vmem>>, vector<1x8x16xf32>
    %86 = vector.shape_cast %85 : vector<1x8x16xf32> to vector<8x16xf32>
    %87 = vector.shape_cast %84 : vector<16x16xf32> to vector<2x8x16xf32>
    %cst_52 = arith.constant dense<0.000000e+00> : vector<8x16xf32>
    %88 = vector.multi_reduction <add>, %87, %cst_52 [0] : vector<2x8x16xf32> to vector<8x16xf32>
    %89 = arith.addf %86, %88 : vector<8x16xf32>
    %c2_53 = arith.constant 2 : index
    %c0_54 = arith.constant 0 : index
    %c0_55 = arith.constant 0 : index
    %90 = vector.load %arg6[%c2_53, %c0_54, %c0_55] : memref<4x8x16xf32, #tpu.memory_space<vmem>>, vector<1x8x16xf32>
    %91 = vector.shape_cast %90 : vector<1x8x16xf32> to vector<8x16xf32>
    %92 = vector.shape_cast %89 : vector<8x16xf32> to vector<1x8x16xf32>
    tpu.vector_store %arg6[%c2_53, %c0_54, %c0_55], %92 {strides = array<i32>} : memref<4x8x16xf32, #tpu.memory_space<vmem>>, vector<1x8x16xf32>,
    %93 = vector.extract_strided_slice %26 {offsets = [3, 0, 0], sizes = [1, 16, 16], strides = [1, 1, 1]} : vector<4x16x16xf32> to vector<1x16x16xf32>
    %94 = vector.shape_cast %93 : vector<1x16x16xf32> to vector<16x16xf32>
    %c3 = arith.constant 3 : index
    %c0_56 = arith.constant 0 : index
    %c0_57 = arith.constant 0 : index
    %95 = vector.load %arg7[%c3, %c0_56, %c0_57] : memref<4x8x16xf32, #tpu.memory_space<vmem>>, vector<1x8x16xf32>
    %96 = vector.shape_cast %95 : vector<1x8x16xf32> to vector<8x16xf32>
    %97 = vector.shape_cast %94 : vector<16x16xf32> to vector<2x8x16xf32>
    %cst_58 = arith.constant dense<0.000000e+00> : vector<8x16xf32>
    %98 = vector.multi_reduction <add>, %97, %cst_58 [0] : vector<2x8x16xf32> to vector<8x16xf32>
    %99 = arith.addf %96, %98 : vector<8x16xf32>
    %c3_59 = arith.constant 3 : index
    %c0_60 = arith.constant 0 : index
    %c0_61 = arith.constant 0 : index
    %100 = vector.load %arg7[%c3_59, %c0_60, %c0_61] : memref<4x8x16xf32, #tpu.memory_space<vmem>>, vector<1x8x16xf32>
    %101 = vector.shape_cast %100 : vector<1x8x16xf32> to vector<8x16xf32>
    %102 = vector.shape_cast %99 : vector<8x16xf32> to vector<1x8x16xf32>
    tpu.vector_store %arg7[%c3_59, %c0_60, %c0_61], %102 {strides = array<i32>} : memref<4x8x16xf32, #tpu.memory_space<vmem>>, vector<1x8x16xf32>,
    %c3_i32 = arith.constant 3 : i32
    %103 = vector.broadcast %c3_i32 : i32 to vector<16x16xi32>
    %104 = arith.cmpi eq, %12, %103 : vector<16x16xi32>
    %cst_62 = arith.constant 0.000000e+00 : f32
    %105 = vector.broadcast %cst_62 : f32 to vector<16x16xf32>
    %106 = arith.select %104, %94, %105 : vector<16x16xi1>, vector<16x16xf32>
    %c3_63 = arith.constant 3 : index
    %c0_64 = arith.constant 0 : index
    %c0_65 = arith.constant 0 : index
    %107 = vector.load %arg6[%c3_63, %c0_64, %c0_65] : memref<4x8x16xf32, #tpu.memory_space<vmem>>, vector<1x8x16xf32>
    %108 = vector.shape_cast %107 : vector<1x8x16xf32> to vector<8x16xf32>
    %109 = vector.shape_cast %106 : vector<16x16xf32> to vector<2x8x16xf32>
    %cst_66 = arith.constant dense<0.000000e+00> : vector<8x16xf32>
    %110 = vector.multi_reduction <add>, %109, %cst_66 [0] : vector<2x8x16xf32> to vector<8x16xf32>
    %111 = arith.addf %108, %110 : vector<8x16xf32>
    %c3_67 = arith.constant 3 : index
    %c0_68 = arith.constant 0 : index
    %c0_69 = arith.constant 0 : index
    %112 = vector.load %arg6[%c3_67, %c0_68, %c0_69] : memref<4x8x16xf32, #tpu.memory_space<vmem>>, vector<1x8x16xf32>
    %113 = vector.shape_cast %112 : vector<1x8x16xf32> to vector<8x16xf32>
    %114 = vector.shape_cast %111 : vector<8x16xf32> to vector<1x8x16xf32>
    tpu.vector_store %arg6[%c3_67, %c0_68, %c0_69], %114 {strides = array<i32>} : memref<4x8x16xf32, #tpu.memory_space<vmem>>, vector<1x8x16xf32>,
    %115 = arith.extui %5 : i1 to i32
    %c0_i32_70 = arith.constant 0 : i32
    %116 = arith.cmpi ne, %115, %c0_i32_70 : i32
    scf.if %116 {
      %c0_71 = arith.constant 0 : index
      %c0_72 = arith.constant 0 : index
      %c0_73 = arith.constant 0 : index
      %117 = vector.load %arg6[%c0_71, %c0_72, %c0_73] : memref<4x8x16xf32, #tpu.memory_space<vmem>>, vector<4x8x16xf32>
      %cst_74 = arith.constant dense<0.000000e+00> : vector<4x16xf32>
      %118 = vector.multi_reduction <add>, %117, %cst_74 [1] : vector<4x8x16xf32> to vector<4x16xf32>
      %c0_75 = arith.constant 0 : index
      %c0_76 = arith.constant 0 : index
      %c0_77 = arith.constant 0 : index
      %119 = vector.load %arg7[%c0_75, %c0_76, %c0_77] : memref<4x8x16xf32, #tpu.memory_space<vmem>>, vector<4x8x16xf32>
      %cst_78 = arith.constant dense<0.000000e+00> : vector<4x16xf32>
      %120 = vector.multi_reduction <add>, %119, %cst_78 [1] : vector<4x8x16xf32> to vector<4x16xf32>
      %cst_79 = arith.constant 2.000000e+00 : f32
      %121 = vector.broadcast %cst_79 : f32 to vector<4x16xf32>
      %122 = arith.mulf %121, %120 : vector<4x16xf32>
      %123 = arith.subf %122, %118 : vector<4x16xf32>
      %cst_80 = arith.constant 1.000000e+00 : f32
      %124 = vector.broadcast %cst_80 : f32 to vector<4x16xf32>
      %125 = arith.addf %123, %124 : vector<4x16xf32>
      %126 = arith.divf %118, %125 : vector<4x16xf32>
      %cst_81 = arith.constant 1.000000e+00 : f32
      %127 = vector.broadcast %cst_81 : f32 to vector<4x16xf32>
      %128 = arith.subf %127, %126 : vector<4x16xf32>
      %c0_82 = arith.constant 0 : index
      %c0_83 = arith.constant 0 : index
      %129 = vector.load %arg5[%c0_82, %c0_83] : memref<4x16xf32, #tpu.memory_space<vmem>>, vector<4x16xf32>
      tpu.vector_store %arg5[%c0_82, %c0_83], %128 {strides = array<i32>} : memref<4x16xf32, #tpu.memory_space<vmem>>, vector<4x16xf32>,
    } else {
    }
    return
  }
  func.func @transform_0(%arg0: i32, %arg1: i32, %arg2: i32) -> (i32, i32, i32, i32) {
    %c0_i32 = arith.constant 0 : i32
    %c0_i32_0 = arith.constant 0 : i32
    return %arg1, %c0_i32, %arg2, %arg0 : i32, i32, i32, i32
  }
  func.func @transform_1(%arg0: i32, %arg1: i32, %arg2: i32) -> (i32, i32, i32) {
    %c0_i32 = arith.constant 0 : i32
    return %arg1, %arg2, %arg0 : i32, i32, i32
  }
  func.func @transform_2(%arg0: i32, %arg1: i32, %arg2: i32) -> (i32, i32) {
    %c0_i32 = arith.constant 0 : i32
    %c0_i32_0 = arith.constant 0 : i32
    return %c0_i32, %arg0 : i32, i32
  }
}

</mosaic_0001>

<bundles_post_ra>
// kernel: tpu_custom_call.1
= control target key start
LH: loop header
LB: loop body
LE: loop exit
PB: predicated region body
PF: predicated region fallthrough
CT: control target
= control target key end

     0   :  { %7 = vsyncpa [#allocation5], 0  ;;  %s1191_s0 = inlined_call_operand.hbm [shape: f32[2,4,16,16], index: 0, kind: input, shape index: {}]   ;;  %s1192_s1 = inlined_call_operand.hbm [shape: s8[2,16,16], index: 1, kind: input, shape index: {}]   ;;  %s1193_s2 = inlined_call_operand.hbm [shape: f32[4,16], index: 2, kind: output, shape index: {}]  }
   0x1   :  { %9 = vsyncpa [#allocation5 + $0x1], 0 }
   0x2   :  { %10 = vsyncpa [#allocation8], 0 }
   0x3   :  { %12 = vsyncpa [#allocation8 + $0x1], 0 }
   0x4   :  { %13 = vsyncpa [#allocation6], 0  ;;  %s901_s9 = smov 0   ;;  %s903_s10 = smov 0  }
   0x5   :  { %s905_s11 = smov 0   ;;  %s907_s12 = smov 0  }
   0x6   :  { %s909_s13 = smov 0   ;;  %s911_s14 = smov 0  }
   0x7 LB: > { %s606_s15 = sadd.s32 4294967295, %s876_s14   ;;  %s34_s16 = sadd.s32 1, %s872_s13  ;;  %s876_s14 = sphi %s911_s14, %s19_s14   ;;  %s872_s13 = sphi %s909_s13, %s1205_s13   ;;  %s868_s12 = sphi %s907_s12, %s1204_s12   ;;  %s864_s11 = sphi %s905_s11, %s1203_s11   ;;  %s860_s10 = sphi %s903_s10, %s1202_s10   ;;  %s856_s9 = sphi %s901_s9, %s1201_s9  }
   0x8   : > { %p36_p0 = scmp.ge.s32.totalorder %s34_s16, 2  ;;  %s49_s17 = sadd.s32 1, %s864_s11 }
   0x9   : > { %p56_p1 = scmp.ne.s32.totalorder %s864_s11, %s860_s10  ;;  %p57_p2 = scmp.eq.s32.totalorder %s876_s14, 0 }
   0xa   : > { %s1207_s16 = smov (%p36_p0, %s34_s16), 0  ;;  %p62_p4 = scmp.ne.s32.totalorder %s860_s10, %s856_s9 }
   0xb   : > { %p937_p3 = por %p57_p2, %p56_p1  ;;  %s42_s19 = ssub.s32 %s872_s13, %s1207_s16 }
   0xc   : > { %p63_p5 = scmp.eq.s32.totalorder %s606_s15, 0  ;;  %p47_p6 = scmp.eq.s32.totalorder %s42_s19, 0 }
   0xd   : > { %p647_p8 = scmp.lt.s32.totalorder %s876_s14, 2  ;;  %s955_s22 = sand.u32 1, %s864_s11  }
   0xe   : > { %p946_p7 = por %p63_p5, %p62_p4  ;;  %s624_s23 = sshll.u32 %s872_s13, 10 }
   0xf   : > { %s952_s21 = scalar_select %p47_p6, %s864_s11, %s49_s17  }
  0x10   : > { %s1196_s20 = scalar_select %p946_p7, 1, 0 }
  0x11   : > { %s609_s24 = sshll.u32 %s955_s22, 6  ;;  %s962_s27 = scalar_lea.hbm %s1191_s0, %s624_s23 }
  0x12   : > { %s146_s28 = scalar_lea.vmem [#allocation4], %s609_s24  ;;  %p966_p9 = pnand %p647_p8, %p937_p3 }
  0x13   : > { %s156_s29 = sshll.u32 %s146_s28, 4  ;;  %s143_s3 = scalar_lea.sflag [#allocation5], %s955_s22  ;;  %s970_s29 = int_to_ptr.vmem [resolvable:$true] %s156_s29 }
  0x14   : > { %s732_s4 = scalar_lea.hbm %s962_s27, 1024  ;;  %p734_p11 = pneg %p966_p9 }
  0x15   : > { %p733_p10 = scmp.ne.s32.totalorder %s962_s27, %s732_s4  ;;  %s737_s7 = scalar_lea.hbm %s1191_s0, 2048 }
  0x16   : > { %p738_p0 = scmp.lt.u32.totalorder %s962_s27, %s1191_s0  ;;  %p739_p1 = scmp.lt.u32.totalorder %s737_s7, %s732_s4 }
  0x17   : > { %p735_p12 = pnand %p734_p11, %p733_p10  ;;  %p741_p3 = scmp.lt.u32.totalorder %s732_s4, %s962_s27 }
  0x18   : > { %p740_p2 = por %p739_p1, %p738_p0 }
  0x19   : > { %p736_p13 = pneg %p735_p12 }
  0x1a   : > { %p742_p4 = por %p741_p3, %p740_p2 }
  0x1c   : > { %p743_p5 = pnand %p742_p4, %p736_p13 }
  0x1e   : > { %746 = shalt.err (!%p743_p5)
}
  0x1f   : > { %s747_s17 = scalar_lea.vmem %s970_s29, 1024  ;;  %s878_s18 = smov [#allocation4]  }
  0x20   : > { %p748_p6 = scmp.ne.s32.totalorder %s970_s29, %s747_s17  ;;  %s752_s19 = sshll.u32 %s878_s18, 4  ;;  %s753_s19 = int_to_ptr.vmem [resolvable:$false] %s752_s19 }
  0x21   : > { %s754_s23 = scalar_lea.vmem %s753_s19, 2048  ;;  %p755_p12 = scmp.lt.s32.totalorder %s970_s29, %s753_s19 }
  0x22   : > { %p750_p8 = pnand %p748_p6, %p734_p11  ;;  %p756_p0 = scmp.lt.s32.totalorder %s754_s23, %s747_s17 }
  0x24   : > { %p751_p10 = pneg %p750_p8  ;;  %p757_p1 = por %p756_p0, %p755_p12 }
  0x26   : > { %p758_p2 = pnand %p757_p1, %p751_p10 }
  0x28   : > { %761 = shalt.err (!%p758_p2)
}
  0x29   : > { %s879_s24 = smov 128   ;;  %s880_s25 = smov 8  }
  0x2a   : > { %643 = dma.hbm_to_vmem [thread:$0]  (!%p966_p9), %s962_s27, 1024, %s970_s29, %s143_s3, %s879_s24, %s879_s24, %s880_s25  }
  0x2b   : > { %p615_p13 = scmp.ge.s32.totalorder %s876_s14, 1  ;;  %p188_p3 = scmp.lt.s32.totalorder %s876_s14, 3 }
  0x2c   : > { %s612_s26 = sshll.u32 %s955_s22, 2  ;;  %s625_s4 = sshll.u32 %s872_s13, 6 }
  0x2d   : > { %p1003_p4 = pnand %p615_p13, %p188_p3  ;;  %s170_s5 = scalar_lea.vmem [#allocation7], %s612_s26 }
  0x2e   : > { %s180_s6 = sshll.u32 %s170_s5, 4  ;;  %s1011_s9 = scalar_lea.hbm %s1192_s1, %s625_s4  ;;  %s1013_s6 = int_to_ptr.vmem [resolvable:$true] %s180_s6 }
  0x2f   : > { %s167_s27 = scalar_lea.sflag [#allocation8], %s955_s22  ;;  %s762_s29 = scalar_lea.hbm %s1011_s9, 64 }
  0x30   : > { %p763_p5 = scmp.ne.s32.totalorder %s1011_s9, %s762_s29  ;;  %s767_s18 = scalar_lea.hbm %s1192_s1, 128 }
  0x31   : > { %p768_p10 = scmp.lt.u32.totalorder %s1011_s9, %s1192_s1  ;;  %p769_p12 = scmp.lt.u32.totalorder %s767_s18, %s762_s29 }
  0x32   : > { %p765_p6 = pnand %p763_p5, %p734_p11  ;;  %p771_p1 = scmp.lt.u32.totalorder %s762_s29, %s1011_s9 }
  0x33   : > { %p770_p0 = por %p769_p12, %p768_p10 }
  0x34   : > { %p766_p8 = pneg %p765_p6 }
  0x35   : > { %p772_p2 = por %p771_p1, %p770_p0 }
  0x37   : > { %p773_p13 = pnand %p772_p2, %p766_p8 }
  0x39   : > { %776 = shalt.err (!%p773_p13)
}
  0x3a   : > { %s777_s24 = scalar_lea.vmem %s1013_s6, 64  ;;  %s881_s25 = smov [#allocation7]  }
  0x3b   : > { %p778_p3 = scmp.ne.s32.totalorder %s1013_s6, %s777_s24  ;;  %s782_s26 = sshll.u32 %s881_s25, 4  ;;  %s783_s26 = int_to_ptr.vmem [resolvable:$false] %s782_s26 }
  0x3c   : > { %s784_s4 = scalar_lea.vmem %s783_s26, 128  ;;  %p785_p7 = scmp.lt.s32.totalorder %s1013_s6, %s783_s26 }
  0x3d   : > { %p780_p5 = pnand %p778_p3, %p734_p11  ;;  %p786_p10 = scmp.lt.s32.totalorder %s784_s4, %s777_s24 }
  0x3f   : > { %p781_p6 = pneg %p780_p5  ;;  %p787_p12 = por %p786_p10, %p785_p7 }
  0x41   : > { %p788_p0 = pnand %p787_p12, %p781_p6 }
  0x43   : > { %791 = shalt.err (!%p788_p0)
}
  0x44   : > { %s882_s5 = smov 32   ;;  %s883_s7 = smov 2  }
  0x45   : > { %646 = dma.hbm_to_vmem [thread:$0]  (!%p966_p9), %s1011_s9, 64, %s1013_s6, %s167_s27, %s882_s5, %s882_s5, %s883_s7  }
  0x46   : > { %192 = sbr.rel (%p1003_p4) target bundleno = 222 (0xde), region = 28  ;;  %s194_s8 = sand.u32 (!%p1003_p4), 1, %s860_s10  }
  0x47   : > { %s616_s29 = sshll.u32 (!%p1003_p4), %s194_s8, 6  ;;  %s195_s3 = scalar_lea.sflag (!%p1003_p4), [#allocation5], %s194_s8 }
  0x48   : > { %s1044_s17 = scalar_lea.vmem (!%p1003_p4), [#allocation4], %s616_s29  ;;  %p1199_p7 = scmp.ne.s32.totalorder (!%p1003_p4), %s1196_s20, 0 }
  0x4d   : > { %843 = dma.done.wait (%p1199_p7), %s195_s3, 1024  }
  0x4e   : > { %845 = vsyncadd (%p1199_p7), %s195_s3, 4294966272  ;;  %s617_s18 = sshll.u32 %s194_s8, 2  ;;  %s204_s30 = scalar_lea.sflag [#allocation8], %s194_s8 }
  0x4f   : > { %s1050_s22 = scalar_lea.vmem [#allocation7], %s617_s18 }
  0x50   : > { %847 = dma.done.wait (%p1199_p7), %s204_s30, 64  }
  0x51   : > { %849 = vsyncadd (%p1199_p7), %s204_s30, 4294967232  ;;  %p230_p9 = scmp.eq.s32.totalorder %s868_s12, 0  ;;  %p234_p11 = scmp.eq.s32.totalorder %s868_s12, 1 }
  0x52   : > { %vm239_vm0 = vcmask (%p230_p9), 130048   ;;  %v884_v0 = vmov (%p230_p9), 0.0  }
  0x53   : > { %238 = sbr.rel (!%p230_p9) target bundleno = 90 (0x5a), region = 40  ;;  %240 = vst.msk [vmem:[#allocation2] sm:$0xff] (%p230_p9), %vm239_vm0, %v884_v0  ;;  %241 = vst.msk [vmem:[#allocation2 + $0x8] sm:$0xff] (%p230_p9), %vm239_vm0, %v884_v0 }
  0x54   : > { %242 = vst.msk [vmem:[#allocation2 + $0x10] sm:$0xff] (%p230_p9), %vm239_vm0, %v884_v0  ;;  %243 = vst.msk [vmem:[#allocation2 + $0x18] sm:$0xff] (%p230_p9), %vm239_vm0, %v884_v0 }
  0x55   : > { %244 = vst.msk [vmem:[#allocation3] sm:$0xff] (%p230_p9), %vm239_vm0, %v884_v0  ;;  %245 = vst.msk [vmem:[#allocation3 + $0x8] sm:$0xff] (%p230_p9), %vm239_vm0, %v884_v0 }
  0x56   : > { %246 = vst.msk [vmem:[#allocation3 + $0x10] sm:$0xff] (%p230_p9), %vm239_vm0, %v884_v0  ;;  %247 = vst.msk [vmem:[#allocation3 + $0x18] sm:$0xff] (%p230_p9), %vm239_vm0, %v884_v0 }
  0x5a PF: > { %v248_v1 = vld [vmem:[%s1044_s17] sm:$0xff]  ;;  %v249_v2 = vld [vmem:[%s1044_s17 + $0x8] sm:$0xff]  ;;  %v250_v3 = vld [vmem:[%s1044_s17 + $0x10] sm:$0xff]  ;;  %vm260_vm1 = vcmask 130048   ;;  %vm493_vm10 = vcmask (%p234_p11), 1041409   ;;  %vm495_vm11 = vcmask (%p234_p11), 1042434  }
  0x5b   : > { %v251_v4 = vld [vmem:[%s1044_s17 + $0x18] sm:$0xff]  ;;  %v252_v5 = vld [vmem:[%s1044_s17 + $0x20] sm:$0xff]  ;;  %v253_v6 = vld [vmem:[%s1044_s17 + $0x28] sm:$0xff]  ;;  %v261_v7 = vsel %vm260_vm1, %v248_v1, -inf  ;;  %v262_v8 = vsel %vm260_vm1, %v250_v3, -inf  ;;  %v268_v9 = vsel %vm260_vm1, %v249_v2, -inf }
  0x5c   : > { %v254_v10 = vld [vmem:[%s1044_s17 + $0x30] sm:$0xff]  ;;  %v255_v11 = vld [vmem:[%s1044_s17 + $0x38] sm:$0xff]  ;;  %v263_v12 = vsel %vm260_vm1, %v252_v5, -inf  ;;  %v269_v13 = vsel %vm260_vm1, %v251_v4, -inf  ;;  %v270_v14 = vsel %vm260_vm1, %v253_v6, -inf  ;;  %vm497_vm12 = vcmask (%p234_p11), 1043459  }
  0x5d   : > { %v264_v15 = vmax.f32 %v261_v7, %v263_v12  ;;  %v265_v16 = vsel %vm260_vm1, %v254_v10, -inf  ;;  %v271_v17 = vmax.f32 %v268_v9, %v270_v14  ;;  %v272_v18 = vsel %vm260_vm1, %v255_v11, -inf  ;;  %v629_v61 = vld [vmem:[%s1050_s22] sm:$0xf]  }
  0x5e   : > { %v266_v19 = vmax.f32 %v262_v8, %v265_v16  ;;  %v273_v20 = vmax.f32 %v269_v13, %v272_v18  ;;  %v1083_v63 = vunpack.c.0.s8 %v629_v61  ;;  %v1085_v0 = vunpack.c.1.s8 %v629_v61 }
  0x5f   : > { %vm500_vm13 = vcmask (%p234_p11), 125952  }
  0x60   : > { %v267_v21 = vmax.f32 %v264_v15, %v266_v19  ;;  %v274_v22 = vmax.f32 %v271_v17, %v273_v20  ;;  %vm335_vm2 = vcmp.eq.s32.totalorder %v1083_v63, 0  ;;  %vm336_vm3 = vcmp.eq.s32.totalorder %v1085_v0, 0  ;;  %v329_v20 = vld [vmem:[#allocation3] sm:$0xff] }
  0x61   : > { %vm352_vm4 = vcmp.eq.s32.totalorder %v1083_v63, 1  ;;  %vm353_vm5 = vcmp.eq.s32.totalorder %v1085_v0, 1  ;;  %vm370_vm6 = vcmp.eq.s32.totalorder %v1083_v63, 2  ;;  %vm371_vm7 = vcmp.eq.s32.totalorder %v1085_v0, 2 }
  0x62   : > { %v275_v23 = vsub.f32 %v248_v1, %v267_v21  ;;  %v276_v24 = vsub.f32 %v249_v2, %v274_v22  ;;  %v277_v25 = vsub.f32 %v250_v3, %v267_v21  ;;  %v278_v26 = vsub.f32 %v251_v4, %v274_v22 }
  0x63   : > { %v279_v27 = vsub.f32 %v252_v5, %v267_v21  ;;  %v280_v28 = vsub.f32 %v253_v6, %v274_v22  ;;  %v281_v29 = vsub.f32 %v254_v10, %v267_v21  ;;  %v282_v33 = vsub.f32 %v255_v11, %v274_v22 }
  0x64   : > { %v283_v30 = vmul.f32 1.442695, %v275_v23  ;;  %v285_v31 = vmul.f32 1.442695, %v276_v24  ;;  %v287_v32 = vmul.f32 1.442695, %v277_v25 }
  0x65   : > { %v289_v34 = vmul.f32 1.442695, %v278_v26  ;;  %v291_v35 = vmul.f32 1.442695, %v279_v27  ;;  %v293_v36 = vmul.f32 1.442695, %v280_v28 }
  0x66   : > { %704 = vpow2.f32 %v283_v30  ;;  %v295_v37 = vmul.f32 1.442695, %v281_v29  ;;  %v297_v38 = vmul.f32 1.442695, %v282_v33  ;;  %vm388_vm8 = vcmp.eq.s32.totalorder %v1083_v63, 3  ;;  %v346_v24 = vld [vmem:[#allocation3 + $0x8] sm:$0xff] }
  0x67   : > { %706 = vpow2.f32 %v285_v31  ;;  %vm389_vm9 = vcmp.eq.s32.totalorder %v1085_v0, 3  ;;  %v339_v27 = vld [vmem:[#allocation2] sm:$0xff] }
  0x68   : > { %708 = vpow2.f32 %v287_v32  ;;  %v357_v32 = vld [vmem:[#allocation2 + $0x8] sm:$0xff] }
  0x69   : > { %710 = vpow2.f32 %v289_v34 }
  0x6a   : > { %712 = vpow2.f32 %v291_v35 }
  0x6b   : > { %714 = vpow2.f32 %v293_v36 }
  0x6c   : > { %716 = vpow2.f32 %v295_v37 }
  0x6d   : > { %718 = vpow2.f32 %v297_v38 }
  0x70   : > { %v705_v39 = vpop.eup %704 }
  0x71   : > { %v707_v40 = vpop.eup %706  ;;  %v299_v41 = vsel %vm260_vm1, %v705_v39, 0.0 }
  0x72   : > { %v709_v42 = vpop.eup %708  ;;  %v306_v43 = vsel %vm260_vm1, %v707_v40, 0.0 }
  0x73   : > { %v711_v44 = vpop.eup %710  ;;  %v300_v45 = vsel %vm260_vm1, %v709_v42, 0.0 }
  0x74   : > { %v713_v46 = vpop.eup %712  ;;  %v301_v47 = vadd.f32 %v300_v45, %v299_v41  ;;  %v307_v48 = vsel %vm260_vm1, %v711_v44, 0.0 }
  0x75   : > { %v715_v49 = vpop.eup %714  ;;  %v302_v50 = vsel %vm260_vm1, %v713_v46, 0.0  ;;  %v308_v51 = vadd.f32 %v307_v48, %v306_v43 }
  0x76   : > { %v717_v52 = vpop.eup %716  ;;  %v303_v53 = vadd.f32 %v302_v50, %v301_v47  ;;  %v309_v54 = vsel %vm260_vm1, %v715_v49, 0.0 }
  0x77   : > { %v719_v55 = vpop.eup %718  ;;  %v304_v56 = vsel %vm260_vm1, %v717_v52, 0.0  ;;  %v310_v57 = vadd.f32 %v309_v54, %v308_v51 }
  0x78   : > { %v305_v58 = vadd.f32 %v304_v56, %v303_v53  ;;  %v311_v59 = vsel %vm260_vm1, %v719_v55, 0.0 }
  0x79   : > { %v312_v60 = vadd.f32 %v311_v59, %v310_v57  ;;  %v393_v59 = vld [vmem:[#allocation2 + $0x18] sm:$0xff] }
  0x7a   : > { %720 = vrcp.f32 %v305_v58 }
  0x7b   : > { %722 = vrcp.f32 %v312_v60 }
  0x84   : > { %v721_v62 = vpop.eup %720 }
  0x85   : > { %v723_v1 = vpop.eup %722  ;;  %v315_v2 = vmul.f32 %v721_v62, %v305_v58 }
  0x86   : > { %v316_v3 = vmul.f32 %v723_v1, %v312_v60 }
  0x87   : > { %v317_v4 = vsub.f32 2.0, %v315_v2 }
  0x88   : > { %v318_v5 = vsub.f32 2.0, %v316_v3 }
  0x89   : > { %v319_v6 = vmul.f32 %v721_v62, %v317_v4 }
  0x8a   : > { %v320_v7 = vmul.f32 %v723_v1, %v318_v5 }
  0x8b   : > { %v321_v8 = vmul.f32 %v705_v39, %v319_v6  ;;  %v323_v9 = vmul.f32 %v709_v42, %v319_v6  ;;  %v325_v10 = vmul.f32 %v713_v46, %v319_v6  ;;  %v327_v11 = vmul.f32 %v717_v52, %v319_v6  ;;  %v364_v39 = vld [vmem:[#allocation3 + $0x10] sm:$0xff]  ;;  %v382_v52 = vld [vmem:[#allocation3 + $0x18] sm:$0xff] }
  0x8c   : > { %v322_v12 = vmul.f32 %v707_v40, %v320_v7  ;;  %v324_v13 = vmul.f32 %v711_v44, %v320_v7  ;;  %v326_v14 = vmul.f32 %v715_v49, %v320_v7  ;;  %v328_v15 = vmul.f32 %v719_v55, %v320_v7  ;;  %v375_v46 = vld [vmem:[#allocation2 + $0x10] sm:$0xff] }
  0x8d   : > { %v330_v16 = vsel %vm260_vm1, %v321_v8, 0.0  ;;  %v337_v17 = vsel %vm335_vm2, %v321_v8, 0.0  ;;  %v347_v18 = vsel %vm260_vm1, %v323_v9, 0.0  ;;  %v354_v19 = vsel %vm352_vm4, %v323_v9, 0.0 }
  0x8e   : > { %v331_v21 = vsel %vm260_vm1, %v322_v12, 0.0  ;;  %v338_v22 = vsel %vm336_vm3, %v322_v12, 0.0  ;;  %v340_v23 = vsel %vm260_vm1, %v337_v17, 0.0  ;;  %v348_v25 = vsel %vm260_vm1, %v324_v13, 0.0 }
  0x8f   : > { %v332_v26 = vadd.f32 %v331_v21, %v330_v16  ;;  %v341_v28 = vsel %vm260_vm1, %v338_v22, 0.0  ;;  %v349_v29 = vadd.f32 %v348_v25, %v347_v18  ;;  %v355_v30 = vsel %vm353_vm5, %v324_v13, 0.0 }
  0x90   : > { %v342_v31 = vadd.f32 %v341_v28, %v340_v23  ;;  %v358_v33 = vsel %vm260_vm1, %v354_v19, 0.0  ;;  %v359_v34 = vsel %vm260_vm1, %v355_v30, 0.0  ;;  %v365_v35 = vsel %vm260_vm1, %v325_v10, 0.0 }
  0x91   : > { %v333_v36 = vadd.f32 %v332_v26, %v329_v20  ;;  %v350_v37 = vadd.f32 %v349_v29, %v346_v24  ;;  %v360_v38 = vadd.f32 %v359_v34, %v358_v33  ;;  %v366_v40 = vsel %vm260_vm1, %v326_v14, 0.0 }
  0x92   : > { %v343_v41 = vadd.f32 %v342_v31, %v339_v27  ;;  %v367_v42 = vadd.f32 %v366_v40, %v365_v35  ;;  %v372_v43 = vsel %vm370_vm6, %v325_v10, 0.0  ;;  %v373_v44 = vsel %vm371_vm7, %v326_v14, 0.0 }
  0x93   : > { %334 = vst.msk [vmem:[#allocation3] sm:$0xff] %vm260_vm1, %v333_v36  ;;  %351 = vst.msk [vmem:[#allocation3 + $0x8] sm:$0xff] %vm260_vm1, %v350_v37  ;;  %v361_v45 = vadd.f32 %v360_v38, %v357_v32  ;;  %v376_v47 = vsel %vm260_vm1, %v372_v43, 0.0  ;;  %v377_v48 = vsel %vm260_vm1, %v373_v44, 0.0  ;;  %v383_v49 = vsel %vm260_vm1, %v327_v11, 0.0 }
  0x94   : > { %344 = vst.msk [vmem:[#allocation2] sm:$0xff] %vm260_vm1, %v343_v41  ;;  %v368_v50 = vadd.f32 %v367_v42, %v364_v39  ;;  %v378_v51 = vadd.f32 %v377_v48, %v376_v47  ;;  %v384_v53 = vsel %vm260_vm1, %v328_v15, 0.0  ;;  %v390_v54 = vsel %vm388_vm8, %v327_v11, 0.0 }
  0x95   : > { %362 = vst.msk [vmem:[#allocation2 + $0x8] sm:$0xff] %vm260_vm1, %v361_v45  ;;  %v385_v55 = vadd.f32 %v384_v53, %v383_v49  ;;  %v391_v56 = vsel %vm389_vm9, %v328_v15, 0.0  ;;  %v394_v57 = vsel %vm260_vm1, %v390_v54, 0.0  ;;  %400 = sbr.rel (!%p234_p11) target bundleno = 197 (0xc5), region = 44 }
  0x96   : > { %369 = vst.msk [vmem:[#allocation3 + $0x10] sm:$0xff] %vm260_vm1, %v368_v50  ;;  %v379_v58 = vadd.f32 %v378_v51, %v375_v46  ;;  %v395_v60 = vsel %vm260_vm1, %v391_v56, 0.0 }
  0x97   : > { %v386_v61 = vadd.f32 %v385_v55, %v382_v52  ;;  %v396_v62 = vadd.f32 %v395_v60, %v394_v57 }
  0x98   : > { %380 = vst.msk [vmem:[#allocation2 + $0x10] sm:$0xff] %vm260_vm1, %v379_v58 }
  0x99   : > { %387 = vst.msk [vmem:[#allocation3 + $0x18] sm:$0xff] %vm260_vm1, %v386_v61  ;;  %v397_v63 = vadd.f32 %v396_v62, %v393_v59 }
  0x9a   : > { %v433_v7 = vld [vmem:[#allocation3] sm:$0xff] (%p234_p11)  ;;  %v434_v8 = vld [vmem:[#allocation3 + $0x8] sm:$0xff] (%p234_p11) }
  0x9b   : > { %398 = vst.msk [vmem:[#allocation2 + $0x18] sm:$0xff] %vm260_vm1, %v397_v63  ;;  %v401_v0 = vld [vmem:[#allocation2] sm:$0xff] (%p234_p11)  ;;  %v437_v16 = vsel (%p234_p11), %vm260_vm1, %v433_v7, 0.0  ;;  %v444_v17 = vsel (%p234_p11), %vm260_vm1, %v434_v8, 0.0 }
  0x9c   : > { %v402_v1 = vld [vmem:[#allocation2 + $0x8] sm:$0xff]  ;;  %v405_v4 = vsel %vm260_vm1, %v401_v0, 0.0  ;;  %v438_v22 = vrot.slane %v437_v16, 4  ;;  %v445_v24 = vrot.slane %v444_v17, 4 }
  0x9d   : > { %v412_v5 = vsel %vm260_vm1, %v402_v1, 0.0  ;;  %v406_v9 = vrot.slane %v405_v4, 4  ;;  %v435_v13 = vld [vmem:[#allocation3 + $0x10] sm:$0xff] }
  0x9e   : > { %v413_v10 = vrot.slane %v412_v5, 4  ;;  %v451_v18 = vsel %vm260_vm1, %v435_v13, 0.0  ;;  %v439_v30 = vadd.f32 %v438_v22, %v437_v16  ;;  %v446_v32 = vadd.f32 %v445_v24, %v444_v17 }
  0x9f   : > { %v403_v2 = vld [vmem:[#allocation2 + $0x10] sm:$0xff]  ;;  %v407_v19 = vadd.f32 %v406_v9, %v405_v4  ;;  %v452_v25 = vrot.slane %v451_v18, 4 }
  0xa0   : > { %v419_v6 = vsel %vm260_vm1, %v403_v2, 0.0  ;;  %v436_v14 = vld [vmem:[#allocation3 + $0x18] sm:$0xff]  ;;  %v414_v20 = vadd.f32 %v413_v10, %v412_v5  ;;  %v440_v38 = vrot.slane %v439_v30, 2  ;;  %v447_v40 = vrot.slane %v446_v32, 2 }
  0xa1   : > { %v420_v11 = vrot.slane %v419_v6, 4  ;;  %v458_v26 = vsel %vm260_vm1, %v436_v14, 0.0  ;;  %v408_v27 = vrot.slane %v407_v19, 2  ;;  %v453_v33 = vadd.f32 %v452_v25, %v451_v18 }
  0xa2   : > { %v404_v3 = vld [vmem:[#allocation2 + $0x18] sm:$0xff]  ;;  %v415_v28 = vrot.slane %v414_v20, 2  ;;  %v459_v34 = vrot.slane %v458_v26, 4  ;;  %v441_v45 = vadd.f32 %v440_v38, %v439_v30  ;;  %v448_v47 = vadd.f32 %v447_v40, %v446_v32 }
  0xa3   : > { %v426_v12 = vsel %vm260_vm1, %v404_v3, 0.0  ;;  %v421_v21 = vadd.f32 %v420_v11, %v419_v6  ;;  %v409_v35 = vadd.f32 %v408_v27, %v407_v19  ;;  %v454_v41 = vrot.slane %v453_v33, 2 }
  0xa4   : > { %v427_v15 = vrot.slane %v426_v12, 4  ;;  %v416_v36 = vadd.f32 %v415_v28, %v414_v20  ;;  %v460_v42 = vadd.f32 %v459_v34, %v458_v26  ;;  %v442_v50 = vrot.slane %v441_v45, 1 }
  0xa5   : > { %v422_v29 = vrot.slane %v421_v21, 2  ;;  %v410_v43 = vrot.slane %v409_v35, 1  ;;  %v455_v48 = vadd.f32 %v454_v41, %v453_v33  ;;  %v449_v52 = vrot.slane %v448_v47, 1 }
  0xa6   : > { %v428_v23 = vadd.f32 %v427_v15, %v426_v12  ;;  %v417_v44 = vrot.slane %v416_v36, 1  ;;  %v461_v49 = vrot.slane %v460_v42, 2  ;;  %v443_v57 = vadd.f32 %v442_v50, %v441_v45 }
  0xa7   : > { %v423_v37 = vadd.f32 %v422_v29, %v421_v21  ;;  %v456_v53 = vrot.slane %v455_v48, 1  ;;  %v411_v55 = vadd.f32 %v410_v43, %v409_v35  ;;  %v450_v59 = vadd.f32 %v449_v52, %v448_v47 }
  0xa8   : > { %v429_v31 = vrot.slane %v428_v23, 2  ;;  %v462_v54 = vadd.f32 %v461_v49, %v460_v42  ;;  %v418_v56 = vadd.f32 %v417_v44, %v416_v36  ;;  %v465_v62 = vmul.f32 2.0, %v443_v57 }
  0xa9   : > { %v424_v46 = vrot.slane %v423_v37, 1  ;;  %v457_v60 = vadd.f32 %v456_v53, %v455_v48  ;;  %v466_v1 = vmul.f32 2.0, %v450_v59 }
  0xaa   : > { %v430_v39 = vadd.f32 %v429_v31, %v428_v23  ;;  %v463_v61 = vrot.slane %v462_v54, 1  ;;  %v469_v3 = vsub.f32 %v465_v62, %v411_v55 }
  0xab   : > { %v425_v58 = vadd.f32 %v424_v46, %v423_v37  ;;  %v467_v2 = vmul.f32 2.0, %v457_v60  ;;  %v470_v5 = vsub.f32 %v466_v1, %v418_v56 }
  0xac   : > { %v431_v51 = vrot.slane %v430_v39, 1  ;;  %v464_v0 = vadd.f32 %v463_v61, %v462_v54  ;;  %v473_v7 = vadd.f32 1.0, %v469_v3 }
  0xad   : > { %v471_v6 = vsub.f32 %v467_v2, %v425_v58  ;;  %v474_v9 = vadd.f32 1.0, %v470_v5 }
  0xae   : > { %v432_v63 = vadd.f32 %v431_v51, %v430_v39  ;;  %v468_v4 = vmul.f32 2.0, %v464_v0  ;;  %724 = vrcp.f32 %v473_v7 }
  0xaf   : > { %v475_v10 = vadd.f32 1.0, %v471_v6  ;;  %726 = vrcp.f32 %v474_v9 }
  0xb0   : > { %v472_v8 = vsub.f32 %v468_v4, %v432_v63 }
  0xb1   : > { %728 = vrcp.f32 %v475_v10 }
  0xb2   : > { %v476_v11 = vadd.f32 1.0, %v472_v8 }
  0xb4   : > { %730 = vrcp.f32 %v476_v11 }
  0xb8   : > { %v725_v12 = vpop.eup %724 }
  0xb9   : > { %v727_v13 = vpop.eup %726  ;;  %v478_v14 = vmul.f32 %v725_v12, %v411_v55 }
  0xba   : > { %v480_v16 = vmul.f32 %v727_v13, %v418_v56 }
  0xbb   : > { %v729_v15 = vpop.eup %728  ;;  %v485_v19 = vsub.f32 1.0, %v478_v14 }
  0xbc   : > { %v482_v18 = vmul.f32 %v729_v15, %v425_v58  ;;  %v486_v21 = vsub.f32 1.0, %v480_v16 }
  0xbe   : > { %v731_v17 = vpop.eup %730  ;;  %v487_v22 = vsub.f32 1.0, %v482_v18  ;;  %v494_v24 = vsel %vm493_vm10, %v486_v21, %v485_v19 }
  0xbf   : > { %v484_v20 = vmul.f32 %v731_v17, %v432_v63 }
  0xc0   : > { %v496_v25 = vsel %vm495_vm11, %v487_v22, %v494_v24 }
  0xc1   : > { %v488_v23 = vsub.f32 1.0, %v484_v20 }
  0xc3   : > { %v498_v26 = vsel %vm497_vm12, %v488_v23, %v496_v25 }
  0xc4   : > { %501 = vst.msk [vmem:[#allocation9] sm:$0xf] %vm500_vm13, %v498_v26 }
  0xc5 PF: > { %p1147_p4 = scmp.eq.s32.totalorder %s606_s15, 1  ;;  %s885_s20 = smov [#allocation9]  }
  0xc6   : > { %s511_s28 = sshll.u32 %s885_s20, 4  ;;  %s512_s28 = int_to_ptr.vmem [resolvable:$true] %s511_s28 }
  0xc7   : > { %s792_s6 = scalar_lea.vmem %s512_s28, 64  ;;  %p799_p13 = scmp.lt.s32.totalorder %s512_s28, %s512_s28 }
  0xc8   : > { %p793_p8 = scmp.ne.s32.totalorder %s512_s28, %s792_s6  ;;  %p800_p3 = scmp.lt.s32.totalorder %s792_s6, %s792_s6 }
  0xca   : > { %p794_p1 = pnand %p793_p8, %p1147_p4  ;;  %p801_p5 = por %p800_p3, %p799_p13 }
  0xcc   : > { %p795_p2 = pneg %p794_p1 }
  0xce   : > { %p802_p6 = pnand %p801_p5, %p795_p2 }
  0xd0   : > { %805 = shalt.err (!%p802_p6)
}
  0xd1   : > { %s806_s15 = scalar_lea.hbm %s1193_s2, 64 }
  0xd2   : > { %p807_p10 = scmp.ne.s32.totalorder %s1193_s2, %s806_s15  ;;  %p812_p7 = scmp.lt.u32.totalorder %s806_s15, %s1193_s2 }
  0xd4   : > { %p808_p12 = pnand %p807_p10, %p1147_p4 }
  0xd6   : > { %p809_p0 = pneg %p808_p12 }
  0xd8   : > { %p814_p9 = pnand %p812_p7, %p809_p0 }
  0xda   : > { %817 = shalt.err (!%p814_p9)
}
  0xdb   : > { %637 = dma.vmem_to_hbm [thread:$0]  (%p1147_p4), %s512_s28, 64, %s1193_s2, [#allocation6]  }
  0xdc   : > { %851 = dma.done.wait (%p1147_p4), [#allocation6], 64  }
  0xdd   : > { %853 = vsyncadd (%p1147_p4), [#allocation6], 4294967232 }
  0xde PF: > { %s19_s14 = sadd.s32 1, %s876_s14   ;;  %s1201_s9 = smov %s860_s10 }
  0xdf   : > { %p16_p11 = scmp.ge.s32.totalorder %s19_s14, 4   ;;  %s1202_s10 = smov %s864_s11 }
  0xe0   : > { %s1203_s11 = smov %s952_s21  ;;  %s1204_s12 = smov %s872_s13 }
  0xe1   : > { %s1205_s13 = smov %s1207_s16  ;;  %18 = sbr.rel (!%p16_p11) target bundleno = 7 (0x7), region = 93 }
  0xe8   :  { %524 = vsyncpa [#allocation5], 1 }
  0xe9   :  { %526 = vsyncpa [#allocation5 + $0x1], 1 }
  0xea   :  { %527 = vsyncpa [#allocation8], 1 }
  0xeb   :  { %529 = vsyncpa [#allocation8 + $0x1], 1 }
  0xec   :  { %530 = vsyncpa [#allocation6], 1 }
  0xed   :  { %532 = vsyncpa [#allocation6 + $0x1], 1 }

</bundles_post_ra>
